<compile_context>
chip_gen: v7x
topology: tpu7x:2x2x1
jax: 0.10.0
libtpu: 0.0.40
codegen_flags: <defaults>
</compile_context>

<pallas_src>
import functools

import jax
import jax.numpy as jnp
from jax.experimental import pallas as pl
from jax.experimental.pallas import tpu as pltpu


OUT_W = 128  # packed output width: lane 0 = y0, lane 1 = y1, lane 2 = t_pred, rest zero


def _round_up(x, m):
    return (x + m - 1) // m * m


def hydranet_kernel(x_ref, tr_ref, hd_ref, out_ref, *, dp, tw, hw):
    x = x_ref[...]                                   # (bm, dp) — last col of real rows is 1.0

    # ---- shared trunk: 3 x (Linear + ReLU); biases folded via the ones lane ----
    z = jnp.maximum(
        jnp.dot(x, tr_ref[0:dp, :], preferred_element_type=jnp.float32), 0.0)
    z = jnp.maximum(
        jnp.dot(z, tr_ref[dp:dp + tw, :], preferred_element_type=jnp.float32), 0.0)
    z = jnp.maximum(
        jnp.dot(z, tr_ref[dp + tw:dp + 2 * tw, :], preferred_element_type=jnp.float32), 0.0)

    # ---- heads stage 1 (fused [a1 | d1 | wt], 128-lane padded) ----
    h1 = jnp.dot(z, hd_ref[0:tw, :], preferred_element_type=jnp.float32)
    h = jnp.maximum(h1, 0.0)          # full-width ReLU; zero rows of stage-2 W kill extra lanes
    sg = jax.nn.sigmoid(h1)           # full-width sigmoid; only the treat lane survives SEL

    # ---- heads stage 2: blockdiag(a2, d2), zero-padded to (hw, hw) ----
    h = jnp.maximum(
        jnp.dot(h, hd_ref[tw:tw + hw, :], preferred_element_type=jnp.float32), 0.0)

    # ---- heads stage 3 + treat routing: y0 -> lane 0, y1 -> lane 1, sigmoid(t) -> lane 2 ----
    slab = (jnp.dot(h, hd_ref[tw + hw:tw + 2 * hw, :], preferred_element_type=jnp.float32)
            + jnp.dot(sg, hd_ref[tw + 2 * hw:tw + 3 * hw, :], preferred_element_type=jnp.float32))

    # ---- single unmasked full-width store ----
    out_ref[...] = slab[:, :OUT_W]


def pack_params(params, input_dim, shared_hidden, outcome_hidden):
    """Pack the 22 nn.Linear tensors into 2 lane-dense slabs + the eps scalar.

    Trunk slab (width tw):  [W1+b1-row | W2+b2-row | W3+b3-row], ones-lane at col SH.
    Head slab  (width hw):  [WH1 | WH2 | WH3 | SEL], ones-lane at col 2*OH+1; SEL routes
                            the sigmoid'd treat lane (2*OH) to output lane 2.
    """
    (w1, b1, w2, b2, w3, b3,
     wt, bt,
     a1, c1, a2, c2, a3, c3,
     d1, e1, d2, e2, d3, e3,
     ew, eb) = params
    D, SH, OH = input_dim, shared_hidden, outcome_hidden

    dp = _round_up(D + 1, 8)           # input features + ones column, sublane aligned
    tw = _round_up(SH + 1, 128)        # trunk width + ones lane, lane aligned
    hw = _round_up(2 * OH + 2, 128)    # [h_y0 | h_y1 | treat | ones] lanes, lane aligned
    z1 = SH                            # ones lane in trunk width
    l1 = 2 * OH + 1                    # ones lane in head width

    # ---- trunk slab ----
    trunk = jnp.zeros((dp + 2 * tw, tw), jnp.float32)
    trunk = trunk.at[0:D, 0:SH].set(w1)
    trunk = trunk.at[D, 0:SH].set(b1[0])
    trunk = trunk.at[D, z1].set(1.0)
    o = dp
    trunk = trunk.at[o:o + SH, 0:SH].set(w2)
    trunk = trunk.at[o + z1, 0:SH].set(b2[0])
    trunk = trunk.at[o + z1, z1].set(1.0)
    o = dp + tw
    trunk = trunk.at[o:o + SH, 0:SH].set(w3)
    trunk = trunk.at[o + z1, 0:SH].set(b3[0])
    trunk = trunk.at[o + z1, z1].set(1.0)

    # ---- head slab ----
    head = jnp.zeros((tw + 3 * hw, hw), jnp.float32)
    # WH1: [a1 | d1 | wt] with bias row (c1 | e1 | bt) at the trunk ones lane
    head = head.at[0:SH, 0:OH].set(a1)
    head = head.at[0:SH, OH:2 * OH].set(d1)
    head = head.at[0:SH, 2 * OH:2 * OH + 1].set(wt)
    head = head.at[z1, 0:OH].set(c1[0])
    head = head.at[z1, OH:2 * OH].set(e1[0])
    head = head.at[z1, 2 * OH].set(bt[0, 0])
    head = head.at[z1, l1].set(1.0)
    # WH2: blockdiag(a2, d2) with bias row (c2 | e2) at the head ones lane
    o = tw
    head = head.at[o:o + OH, 0:OH].set(a2)
    head = head.at[o + OH:o + 2 * OH, OH:2 * OH].set(d2)
    head = head.at[o + l1, 0:OH].set(c2[0])
    head = head.at[o + l1, OH:2 * OH].set(e2[0])
    head = head.at[o + l1, l1].set(1.0)
    # WH3: col 0 = a3 (+c3), col 1 = d3 (+e3)
    o = tw + hw
    head = head.at[o:o + OH, 0].set(a3[:, 0])
    head = head.at[o + OH:o + 2 * OH, 1].set(d3[:, 0])
    head = head.at[o + l1, 0].set(c3[0, 0])
    head = head.at[o + l1, 1].set(e3[0, 0])
    # SEL: 1.0 at (treat lane, output lane 2)
    o = tw + 2 * hw
    head = head.at[o + 2 * OH, 2].set(1.0)

    # epsilon head: Linear(1,1) applied to a column of ones -> x-independent scalar
    eps_scalar = ew[0, 0] + eb[0, 0]

    meta = dict(dp=dp, tw=tw, hw=hw)
    return trunk, head, eps_scalar, meta


def hydranet_pallas(x, trunk, head, *, dp, tw, hw):
    B, D = x.shape

    # batch tiling: one block at small B; 512-row blocks (>= 2 grid steps) at large B
    if B <= 512:
        block_m = _round_up(max(B, 8), 8)
    else:
        block_m = 512
    bp = _round_up(max(B, block_m), block_m)
    grid = (bp // block_m,)

    # batch padding + affine ones column (folds every bias into the matmuls)
    x_aug = jnp.zeros((bp, dp), jnp.float32)
    x_aug = x_aug.at[:B, :D].set(x.astype(jnp.float32))
    x_aug = x_aug.at[:B, D].set(1.0)

    kernel = functools.partial(hydranet_kernel, dp=dp, tw=tw, hw=hw)

    out = pl.pallas_call(
        kernel,
        out_shape=jax.ShapeDtypeStruct((bp, OUT_W), jnp.float32),
        grid=grid,
        in_specs=[
            pl.BlockSpec((block_m, dp), lambda i: (i, 0)),   # x: tiled over batch
            pl.BlockSpec(trunk.shape, lambda i: (0, 0)),     # packed trunk slab (resident)
            pl.BlockSpec(head.shape, lambda i: (0, 0)),      # packed head slab (resident)
        ],
        out_specs=pl.BlockSpec((block_m, OUT_W), lambda i: (i, 0)),
        compiler_params=pltpu.CompilerParams(
            dimension_semantics=("parallel",)),
    )(x_aug, trunk, head)
    return out[:B]


def hydranet_forward(x, params, *, input_dim, shared_hidden, outcome_hidden):
    """Full forward: Pallas kernel + wrapper-side output slicing / eps broadcast."""
    trunk, head, eps_scalar, meta = pack_params(params, input_dim, shared_hidden, outcome_hidden)
    out = hydranet_pallas(x, trunk, head, **meta)
    y0 = out[:, 0:1]
    y1 = out[:, 1:2]          # yt[0] (num_treats == 1)
    t_pred = out[:, 2:3]
    eps = jnp.broadcast_to(eps_scalar, (x.shape[0], 1))
    return y0, y1, t_pred, eps


def init_params(key, input_dim, shared_hidden, outcome_hidden):
    """Deterministic synthetic parameter init (shapes follow the nn.Linear layers)."""
    keys = jax.random.split(key, 32)
    ki = iter(range(32))

    def linear(in_f, out_f):
        kw = keys[next(ki)]
        kb = keys[next(ki)]
        w = jax.random.normal(kw, (in_f, out_f), jnp.float32) / jnp.sqrt(float(in_f))
        b = jax.random.normal(kb, (1, out_f), jnp.float32) * 0.01
        return w, b

    w1, b1 = linear(input_dim, shared_hidden)        # shared trunk
    w2, b2 = linear(shared_hidden, shared_hidden)
    w3, b3 = linear(shared_hidden, shared_hidden)
    wt, bt = linear(shared_hidden, 1)                # treatment head
    a1, c1 = linear(shared_hidden, outcome_hidden)   # y0 head
    a2, c2 = linear(outcome_hidden, outcome_hidden)
    a3, c3 = linear(outcome_hidden, 1)
    d1, e1 = linear(shared_hidden, outcome_hidden)   # yt[0] head
    d2, e2 = linear(outcome_hidden, outcome_hidden)
    d3, e3 = linear(outcome_hidden, 1)
    ew, eb = linear(1, 1)                            # epsilon Linear(1, 1)

    return (w1, b1, w2, b2, w3, b3,
            wt, bt,
            a1, c1, a2, c2, a3, c3,
            d1, e1, d2, e2, d3, e3,
            ew, eb)


def reference_forward(x, params):
    """Pure-JAX reference matching the PyTorch HydraNet.forward semantics."""
    (w1, b1, w2, b2, w3, b3,
     wt, bt,
     a1, c1, a2, c2, a3, c3,
     d1, e1, d2, e2, d3, e3,
     ew, eb) = params
    z = jnp.maximum(x @ w1 + b1, 0.0)
    z = jnp.maximum(z @ w2 + b2, 0.0)
    z = jnp.maximum(z @ w3 + b3, 0.0)
    t_pred = jax.nn.sigmoid(z @ wt + bt)
    h0 = jnp.maximum(z @ a1 + c1, 0.0)
    h0 = jnp.maximum(h0 @ a2 + c2, 0.0)
    y0 = h0 @ a3 + c3
    h1 = jnp.maximum(z @ d1 + e1, 0.0)
    h1 = jnp.maximum(h1 @ d2 + e2, 0.0)
    y1 = h1 @ d3 + e3
    eps = jnp.broadcast_to(ew + eb, (x.shape[0], 1))
    return y0, y1, t_pred, eps


if __name__ == "__main__":
    # Small shapes consistent with the module: batch=8, input_dim=16,
    # shared_hidden=64, outcome_hidden=32, num_treats=1.
    B, D, SH, OH = 8, 16, 64, 32

    key = jax.random.PRNGKey(0)
    kx, kp = jax.random.split(key)
    x = jax.random.normal(kx, (B, D), jnp.float32)
    params = init_params(kp, D, SH, OH)

    y0, y1, t_pred, eps = jax.block_until_ready(
        hydranet_forward(x, params, input_dim=D, shared_hidden=SH, outcome_hidden=OH))
    y0_r, y1_r, t_r, eps_r = reference_forward(x, params)

    assert y0.shape == (B, 1) and y1.shape == (B, 1)
    assert t_pred.shape == (B, 1) and eps.shape == (B, 1)
    assert jnp.allclose(y0, y0_r, atol=2e-5, rtol=2e-5)
    assert jnp.allclose(y1, y1_r, atol=2e-5, rtol=2e-5)
    assert jnp.allclose(t_pred, t_r, atol=2e-5, rtol=2e-5)
    assert jnp.allclose(eps, eps_r, atol=1e-6, rtol=1e-6)

    # NOTE: PyTorch returns yt as a Python list; num_treats=1 here so yt == [y1].
    # TODO(synk): dragonnet_loss / tarreg_loss are training-time losses, not part of forward.
    print("KERNEL_OK")
</pallas_src>

<mosaic_0001>
module attributes {stable_mosaic.version = 11 : i64} {
  func.func @hydranet_kernel(%arg0: i32, %arg1: memref<8x24xf32, #tpu.memory_space<vmem>>, %arg2: memref<280x128xf32, #tpu.memory_space<vmem>>, %arg3: memref<512x128xf32, #tpu.memory_space<vmem>>, %arg4: memref<8x128xf32, #tpu.memory_space<vmem>>) attributes {dimension_semantics = [#tpu.dimension_semantics<parallel>], iteration_bounds = array<i64: 1>, scalar_prefetch = 0 : i64, scratch_operands = 0 : i64, tpu.core_type = #tpu.core_type<tc>, window_params = [{transform_indices = @transform_0, window_bounds = array<i64: 8, 24>}, {pipeline_mode = #tpu.pipeline_mode<synchronous>, transform_indices = @transform_1, window_bounds = array<i64: 280, 128>}, {pipeline_mode = #tpu.pipeline_mode<synchronous>, transform_indices = @transform_2, window_bounds = array<i64: 512, 128>}, {transform_indices = @transform_3, window_bounds = array<i64: 8, 128>}]} {
    %c0 = arith.constant 0 : index
    %c0_0 = arith.constant 0 : index
    %0 = vector.load %arg1[%c0, %c0_0] : memref<8x24xf32, #tpu.memory_space<vmem>>, vector<8x24xf32>
    %c0_1 = arith.constant 0 : index
    %c0_2 = arith.constant 0 : index
    %1 = vector.load %arg2[%c0_1, %c0_2] : memref<280x128xf32, #tpu.memory_space<vmem>>, vector<24x128xf32>
    %cst = arith.constant dense<0.000000e+00> : vector<8x128xf32>
    %2 = tpu.matmul %0, %1, %cst {dimension_numbers = #tpu.dot_dimension_numbers<[1], [0], [0], [1], [0, 0, 1, 1], [], []>} : vector<8x24xf32>, vector<24x128xf32>, vector<8x128xf32> -> vector<8x128xf32>
    %cst_3 = arith.constant 0.000000e+00 : f32
    %3 = vector.broadcast %cst_3 : f32 to vector<8x128xf32>
    %4 = arith.maximumf %2, %3 : vector<8x128xf32>
    %c24 = arith.constant 24 : index
    %c0_4 = arith.constant 0 : index
    %5 = vector.load %arg2[%c24, %c0_4] : memref<280x128xf32, #tpu.memory_space<vmem>>, vector<128x128xf32>
    %cst_5 = arith.constant dense<0.000000e+00> : vector<8x128xf32>
    %6 = tpu.matmul %4, %5, %cst_5 {dimension_numbers = #tpu.dot_dimension_numbers<[1], [0], [0], [1], [0, 0, 1, 1], [], []>} : vector<8x128xf32>, vector<128x128xf32>, vector<8x128xf32> -> vector<8x128xf32>
    %cst_6 = arith.constant 0.000000e+00 : f32
    %7 = vector.broadcast %cst_6 : f32 to vector<8x128xf32>
    %8 = arith.maximumf %6, %7 : vector<8x128xf32>
    %c152 = arith.constant 152 : index
    %c0_7 = arith.constant 0 : index
    %9 = vector.load %arg2[%c152, %c0_7] : memref<280x128xf32, #tpu.memory_space<vmem>>, vector<128x128xf32>
    %cst_8 = arith.constant dense<0.000000e+00> : vector<8x128xf32>
    %10 = tpu.matmul %8, %9, %cst_8 {dimension_numbers = #tpu.dot_dimension_numbers<[1], [0], [0], [1], [0, 0, 1, 1], [], []>} : vector<8x128xf32>, vector<128x128xf32>, vector<8x128xf32> -> vector<8x128xf32>
    %cst_9 = arith.constant 0.000000e+00 : f32
    %11 = vector.broadcast %cst_9 : f32 to vector<8x128xf32>
    %12 = arith.maximumf %10, %11 : vector<8x128xf32>
    %c0_10 = arith.constant 0 : index
    %c0_11 = arith.constant 0 : index
    %13 = vector.load %arg3[%c0_10, %c0_11] : memref<512x128xf32, #tpu.memory_space<vmem>>, vector<128x128xf32>
    %cst_12 = arith.constant dense<0.000000e+00> : vector<8x128xf32>
    %14 = tpu.matmul %12, %13, %cst_12 {dimension_numbers = #tpu.dot_dimension_numbers<[1], [0], [0], [1], [0, 0, 1, 1], [], []>} : vector<8x128xf32>, vector<128x128xf32>, vector<8x128xf32> -> vector<8x128xf32>
    %cst_13 = arith.constant 0.000000e+00 : f32
    %15 = vector.broadcast %cst_13 : f32 to vector<8x128xf32>
    %16 = arith.maximumf %14, %15 : vector<8x128xf32>
    %17 = arith.negf %14 : vector<8x128xf32>
    %18 = math.exp %17 : vector<8x128xf32>
    %cst_14 = arith.constant 1.000000e+00 : f32
    %19 = vector.broadcast %cst_14 : f32 to vector<8x128xf32>
    %20 = arith.addf %19, %18 : vector<8x128xf32>
    %21 = arith.divf %19, %20 : vector<8x128xf32>
    %c128 = arith.constant 128 : index
    %c0_15 = arith.constant 0 : index
    %22 = vector.load %arg3[%c128, %c0_15] : memref<512x128xf32, #tpu.memory_space<vmem>>, vector<128x128xf32>
    %cst_16 = arith.constant dense<0.000000e+00> : vector<8x128xf32>
    %23 = tpu.matmul %16, %22, %cst_16 {dimension_numbers = #tpu.dot_dimension_numbers<[1], [0], [0], [1], [0, 0, 1, 1], [], []>} : vector<8x128xf32>, vector<128x128xf32>, vector<8x128xf32> -> vector<8x128xf32>
    %cst_17 = arith.constant 0.000000e+00 : f32
    %24 = vector.broadcast %cst_17 : f32 to vector<8x128xf32>
    %25 = arith.maximumf %23, %24 : vector<8x128xf32>
    %c256 = arith.constant 256 : index
    %c0_18 = arith.constant 0 : index
    %26 = vector.load %arg3[%c256, %c0_18] : memref<512x128xf32, #tpu.memory_space<vmem>>, vector<128x128xf32>
    %cst_19 = arith.constant dense<0.000000e+00> : vector<8x128xf32>
    %27 = tpu.matmul %25, %26, %cst_19 {dimension_numbers = #tpu.dot_dimension_numbers<[1], [0], [0], [1], [0, 0, 1, 1], [], []>} : vector<8x128xf32>, vector<128x128xf32>, vector<8x128xf32> -> vector<8x128xf32>
    %c384 = arith.constant 384 : index
    %c0_20 = arith.constant 0 : index
    %28 = vector.load %arg3[%c384, %c0_20] : memref<512x128xf32, #tpu.memory_space<vmem>>, vector<128x128xf32>
    %cst_21 = arith.constant dense<0.000000e+00> : vector<8x128xf32>
    %29 = tpu.matmul %21, %28, %cst_21 {dimension_numbers = #tpu.dot_dimension_numbers<[1], [0], [0], [1], [0, 0, 1, 1], [], []>} : vector<8x128xf32>, vector<128x128xf32>, vector<8x128xf32> -> vector<8x128xf32>
    %30 = arith.addf %27, %29 : vector<8x128xf32>
    %c0_22 = arith.constant 0 : index
    %c0_23 = arith.constant 0 : index
    %31 = vector.load %arg4[%c0_22, %c0_23] : memref<8x128xf32, #tpu.memory_space<vmem>>, vector<8x128xf32>
    tpu.vector_store %arg4[%c0_22, %c0_23], %30 {strides = array<i32>} : memref<8x128xf32, #tpu.memory_space<vmem>>, vector<8x128xf32>,
    return
  }
  func.func @transform_0(%arg0: i32) -> (i32, i32) {
    %c0_i32 = arith.constant 0 : i32
    %c0_i32_0 = arith.constant 0 : i32
    return %arg0, %c0_i32 : i32, i32
  }
  func.func @transform_1(%arg0: i32) -> (i32, i32) {
    %c0_i32 = arith.constant 0 : i32
    %c0_i32_0 = arith.constant 0 : i32
    %c0_i32_1 = arith.constant 0 : i32
    return %c0_i32, %c0_i32_0 : i32, i32
  }
  func.func @transform_2(%arg0: i32) -> (i32, i32) {
    %c0_i32 = arith.constant 0 : i32
    %c0_i32_0 = arith.constant 0 : i32
    %c0_i32_1 = arith.constant 0 : i32
    return %c0_i32, %c0_i32_0 : i32, i32
  }
  func.func @transform_3(%arg0: i32) -> (i32, i32) {
    %c0_i32 = arith.constant 0 : i32
    %c0_i32_0 = arith.constant 0 : i32
    return %arg0, %c0_i32 : i32, i32
  }
}

</mosaic_0001>

<bundles_post_ra>
// kernel: tpu_custom_call.1
= control target key start
LH: loop header
LB: loop body
LE: loop exit
PB: predicated region body
PF: predicated region fallthrough
CT: control target
= control target key end

     0   :  { %8 = vsyncpa [#allocation3], 0  ;;  %s1406_s0 = inlined_call_operand.hbm [shape: f32[8,24], index: 0, kind: input, shape index: {}]   ;;  %s1407_s1 = inlined_call_operand.hbm [shape: f32[280,128], index: 1, kind: input, shape index: {}]   ;;  %s1408_s2 = inlined_call_operand.hbm [shape: f32[512,128], index: 2, kind: input, shape index: {}]   ;;  %s1409_s3 = inlined_call_operand.hbm [shape: f32[8,128], index: 3, kind: output, shape index: {}]  }
   0x1   :  { %9 = vsyncpa [#allocation6], 0 }
   0x2   :  { %10 = vsyncpa [#allocation4], 0  ;;  %s1259_s12 = smov [#allocation5]   ;;  %s1165_s16 = scalar_lea.hbm %s1407_s1, 4480 }
   0x3   :  { %s26_s13 = sshll.u32 %s1259_s12, 4  ;;  %p1166_p0 = scmp.ne.s32.totalorder %s1407_s1, %s1165_s16  ;;  %s27_s13 = int_to_ptr.vmem [resolvable:$true] %s26_s13 }
   0x4   :  { %p1169_p1 = scmp.lt.u32.totalorder %s1165_s16, %s1407_s1 }
   0x6   :  { %p1171_p2 = pnand %p1169_p1, %p1166_p0 }
   0x8   :  { %1174 = shalt.err (!%p1171_p2)
}
   0x9   :  { %s1175_s21 = scalar_lea.vmem %s27_s13, 4480  ;;  %p1180_p4 = scmp.lt.s32.totalorder %s27_s13, %s27_s13 }
   0xa   :  { %p1176_p3 = scmp.ne.s32.totalorder %s27_s13, %s1175_s21  ;;  %p1181_p5 = scmp.lt.s32.totalorder %s1175_s21, %s1175_s21 }
   0xc   :  { %p1182_p6 = por %p1181_p5, %p1180_p4 }
   0xe   :  { %p1183_p7 = pnand %p1182_p6, %p1176_p3 }
  0x10   :  { %1186 = shalt.err (!%p1183_p7)
}
  0x11   :  { %s1260_s22 = smov 128   ;;  %s1261_s23 = smov 8  }
  0x12   :  { %32 = dma.hbm_to_vmem [thread:$0]  %s1407_s1, 4480, %s27_s13, [#allocation6], %s1260_s22, %s1260_s22, %s1261_s23  }
  0x13   :  { %s1262_s26 = smov [#allocation2]   ;;  %s1263_s28 = smov [#allocation7]  }
  0x14   :  { %s17_s27 = sshll.u32 %s1262_s26, 4  ;;  %s38_s29 = sshll.u32 %s1263_s28, 4  ;;  %s18_s27 = int_to_ptr.vmem [resolvable:$true] %s17_s27  ;;  %s39_s29 = int_to_ptr.vmem [resolvable:$true] %s38_s29 }
  0x15   :  { %s1187_s5 = scalar_lea.hbm %s1406_s0, 128 }
  0x16   :  { %p1188_p8 = scmp.ne.s32.totalorder %s1406_s0, %s1187_s5  ;;  %p1191_p9 = scmp.lt.u32.totalorder %s1187_s5, %s1406_s0 }
  0x18   :  { %p1193_p10 = pnand %p1191_p9, %p1188_p8 }
  0x1a   :  { %1196 = shalt.err (!%p1193_p10)
}
  0x1b   :  { %s1197_s1 = scalar_lea.vmem %s18_s27, 128  ;;  %p1202_p12 = scmp.lt.s32.totalorder %s18_s27, %s18_s27 }
  0x1c   :  { %p1198_p11 = scmp.ne.s32.totalorder %s18_s27, %s1197_s1  ;;  %p1203_p13 = scmp.lt.s32.totalorder %s1197_s1, %s1197_s1 }
  0x1e   :  { %p1204_p0 = por %p1203_p13, %p1202_p12 }
  0x20   :  { %p1205_p1 = pnand %p1204_p0, %p1198_p11 }
  0x22   :  { %1208 = shalt.err (!%p1205_p1)
}
  0x23   :  { %20 = dma.hbm_to_vmem [thread:$0]  %s1406_s0, 128, %s18_s27, [#allocation3]  }
  0x24   :  { %s1209_s14 = scalar_lea.hbm %s1408_s2, 8192 }
  0x25   :  { %p1210_p2 = scmp.ne.s32.totalorder %s1408_s2, %s1209_s14  ;;  %p1213_p3 = scmp.lt.u32.totalorder %s1209_s14, %s1408_s2 }
  0x27   :  { %p1215_p4 = pnand %p1213_p3, %p1210_p2 }
  0x29   :  { %1218 = shalt.err (!%p1215_p4)
}
  0x2a   :  { %s1219_s19 = scalar_lea.vmem %s39_s29, 8192  ;;  %p1224_p6 = scmp.lt.s32.totalorder %s39_s29, %s39_s29 }
  0x2b   :  { %p1220_p5 = scmp.ne.s32.totalorder %s39_s29, %s1219_s19  ;;  %p1225_p7 = scmp.lt.s32.totalorder %s1219_s19, %s1219_s19 }
  0x2d   :  { %p1226_p8 = por %p1225_p7, %p1224_p6 }
  0x2f   :  { %p1227_p9 = pnand %p1226_p8, %p1220_p5 }
  0x31   :  { %1230 = shalt.err (!%p1227_p9)
}
  0x32   :  { %44 = dma.hbm_to_vmem [thread:$0]  %s1408_s2, 8192, %s39_s29, [#allocation6], %s1260_s22, %s1260_s22, %s1261_s23  }
  0x33   :  { %1253 = dma.done.wait [#allocation3], 128  }
  0x34   :  { %1254 = vsyncadd [#allocation3], 4294967168 }
  0x35   :  { %1255 = dma.done.wait [#allocation6], 12672  }
  0x36   :  { %1256 = vsyncadd [#allocation6], 4294954624  ;;  %v1264_v0 = vmov 0.0|0.0   ;;  %vm1265_vm0 = vmmov 0   ;;  %v1266_v1 = vmov 0.0   ;;  %v55_v2 = vld [vmem:[#allocation5] sm:$0xff] }
  0x37   :  { %1003 = vmatprep.subr.bf16.mxu0 %v1264_v0  ;;  %790 = vmatprep.mubr.msk.f32.mxu0 %vm1265_vm0, %v1266_v1  ;;  %v56_v3 = vld [vmem:[#allocation5 + $0x8] sm:$0xff]  ;;  %v133_v5 = vld [vmem:[#allocation5 + $0x18] sm:$0xff]  ;;  %v134_v6 = vld [vmem:[#allocation5 + $0x20] sm:$0xff]  ;;  %vm58_vm1 = vcmask 195584   ;;  %s1267_s2 = smov [#allocation8]  }
  0x38   :  { %1054 = vmatprep.subr.bf16.mxu1 %v1264_v0  ;;  %895 = vmatprep.mubr.msk.f32.mxu1 %vm1265_vm0, %v1266_v1  ;;  %v1004_v4 = vpack.c.bf16 %v56_v3, %v55_v2  ;;  %v57_v7 = vld [vmem:[#allocation5 + $0x10] sm:$0xff]  ;;  %v54_v8 = vld [vmem:[#allocation2] sm:$0xff]  ;;  %v1007_v9 = vpack.c.bf16 %v134_v6, %v133_v5  ;;  %v135_v10 = vld [vmem:[#allocation5 + $0x28] sm:$0xff]  ;;  %s666_s21 = sshll.u32 %s1267_s2, 4  ;;  %s667_s21 = int_to_ptr.vmem [resolvable:$true] %s666_s21 }
  0x39   :  { %v136_v11 = vld [vmem:[#allocation5 + $0x30] sm:$0xff]  ;;  %v137_v13 = vld [vmem:[#allocation5 + $0x38] sm:$0xff]  ;;  %v138_v14 = vld [vmem:[#allocation5 + $0x40] sm:$0xff]  ;;  %s1231_s22 = scalar_lea.vmem %s667_s21, 128  ;;  %p1236_p11 = scmp.lt.s32.totalorder %s667_s21, %s667_s21 }
  0x3a   :  { %1005 = vmatpush3.bf16.msra.mxu0 %v1004_v4  ;;  %v1010_v12 = vpack.c.bf16 %v136_v11, %v135_v10  ;;  %v1013_v15 = vpack.c.bf16 %v138_v14, %v137_v13  ;;  %v139_v16 = vld [vmem:[#allocation5 + $0x48] sm:$0xff]  ;;  %v140_v17 = vld [vmem:[#allocation5 + $0x50] sm:$0xff]  ;;  %v141_v19 = vld [vmem:[#allocation5 + $0x58] sm:$0xff]  ;;  %p1232_p10 = scmp.ne.s32.totalorder %s667_s21, %s1231_s22  ;;  %p1237_p12 = scmp.lt.s32.totalorder %s1231_s22, %s1231_s22 }
  0x3b   :  { %788 = vmatprep.subr.mxu0 %v1266_v1  ;;  %v1016_v18 = vpack.c.bf16 %v140_v17, %v139_v16  ;;  %v142_v20 = vld [vmem:[#allocation5 + $0x60] sm:$0xff]  ;;  %v143_v22 = vld [vmem:[#allocation5 + $0x68] sm:$0xff]  ;;  %v144_v23 = vld [vmem:[#allocation5 + $0x70] sm:$0xff] }
  0x3c   :  { %v1019_v21 = vpack.c.bf16 %v142_v20, %v141_v19  ;;  %v1022_v24 = vpack.c.bf16 %v144_v23, %v143_v22  ;;  %v145_v25 = vld [vmem:[#allocation5 + $0x78] sm:$0xff]  ;;  %v146_v26 = vld [vmem:[#allocation5 + $0x80] sm:$0xff]  ;;  %v147_v28 = vld [vmem:[#allocation5 + $0x88] sm:$0xff]  ;;  %p1238_p13 = por %p1237_p12, %p1236_p11 }
  0x3d   :  { %v1025_v27 = vpack.c.bf16 %v146_v26, %v145_v25  ;;  %v148_v29 = vld [vmem:[#allocation5 + $0x90] sm:$0xff]  ;;  %v220_v31 = vld [vmem:[#allocation5 + $0x98] sm:$0xff]  ;;  %v221_v32 = vld [vmem:[#allocation5 + $0xa0] sm:$0xff] }
  0x3e   :  { %789 = vmatpush3.msra.mxu0 %v57_v7  ;;  %v1028_v30 = vpack.c.bf16 %v148_v29, %v147_v28  ;;  %v1031_v34 = vpack.c.bf16 %v221_v32, %v220_v31  ;;  %v222_v37 = vld [vmem:[#allocation5 + $0xa8] sm:$0xff]  ;;  %v223_v38 = vld [vmem:[#allocation5 + $0xb0] sm:$0xff]  ;;  %v224_v40 = vld [vmem:[#allocation5 + $0xb8] sm:$0xff]  ;;  %p1239_p0 = pnand %p1238_p13, %p1232_p10 }
  0x3f   :  { %791 = vmatmul.mubr.msk.f32.vlgmr.msra.gmra.mrb[0].mxu0 %vm58_vm1, %v54_v8  ;;  %1006 = vmatprep.subr.bf16.mxu0 %v1264_v0  ;;  %v1034_v39 = vpack.c.bf16 %v223_v38, %v222_v37  ;;  %v225_v41 = vld [vmem:[#allocation5 + $0xc0] sm:$0xff]  ;;  %v226_v43 = vld [vmem:[#allocation5 + $0xc8] sm:$0xff]  ;;  %v227_v44 = vld [vmem:[#allocation5 + $0xd0] sm:$0xff] }
  0x40   :  { %1008 = vmatpush3.bf16.msra.mxu0 %v1007_v9  ;;  %825 = vmatprep.mubr.msk.f32.mxu0 %vm1265_vm0, %v1266_v1  ;;  %v1037_v42 = vpack.c.bf16 %v225_v41, %v224_v40  ;;  %v1040_v45 = vpack.c.bf16 %v227_v44, %v226_v43  ;;  %v228_v46 = vld [vmem:[#allocation5 + $0xd8] sm:$0xff]  ;;  %v229_v47 = vld [vmem:[#allocation5 + $0xe0] sm:$0xff]  ;;  %v230_v49 = vld [vmem:[#allocation5 + $0xe8] sm:$0xff] }
  0x41   :  { %1009 = vmatprep.subr.bf16.mxu0 %v1264_v0  ;;  %v1043_v48 = vpack.c.bf16 %v229_v47, %v228_v46  ;;  %v231_v50 = vld [vmem:[#allocation5 + $0xf0] sm:$0xff]  ;;  %v232_v52 = vld [vmem:[#allocation5 + $0xf8] sm:$0xff]  ;;  %v233_v53 = vld [vmem:[#allocation5 + $0x100] sm:$0xff] }
  0x42   :  { %v1046_v51 = vpack.c.bf16 %v231_v50, %v230_v49  ;;  %v1049_v54 = vpack.c.bf16 %v233_v53, %v232_v52  ;;  %v234_v55 = vld [vmem:[#allocation5 + $0x108] sm:$0xff]  ;;  %v235_v56 = vld [vmem:[#allocation5 + $0x110] sm:$0xff]  ;;  %v307_v58 = vld [vmem:[#allocation7] sm:$0xff] }
  0x43   :  { %v1052_v57 = vpack.c.bf16 %v235_v56, %v234_v55  ;;  %v308_v59 = vld [vmem:[#allocation7 + $0x8] sm:$0xff]  ;;  %v309_v60 = vld [vmem:[#allocation7 + $0x10] sm:$0xff]  ;;  %v310_v62 = vld [vmem:[#allocation7 + $0x18] sm:$0xff] }
  0x44   :  { %1011 = vmatpush3.bf16.msra.mxu0 %v1010_v12  ;;  %v1055_v61 = vpack.c.bf16 %v308_v59, %v307_v58  ;;  %v1058_v63 = vpack.c.bf16 %v310_v62, %v309_v60  ;;  %v311_v2 = vld [vmem:[#allocation7 + $0x20] sm:$0xff]  ;;  %v312_v3 = vld [vmem:[#allocation7 + $0x28] sm:$0xff]  ;;  %v313_v5 = vld [vmem:[#allocation7 + $0x30] sm:$0xff] }
  0x45   :  { %1012 = vmatprep.subr.bf16.mxu0 %v1264_v0  ;;  %v1061_v4 = vpack.c.bf16 %v312_v3, %v311_v2  ;;  %v314_v6 = vld [vmem:[#allocation7 + $0x38] sm:$0xff]  ;;  %v315_v8 = vld [vmem:[#allocation7 + $0x40] sm:$0xff]  ;;  %v316_v9 = vld [vmem:[#allocation7 + $0x48] sm:$0xff] }
  0x46   :  { %1056 = vmatpush3.bf16.msra.mxu1 %v1055_v61  ;;  %v1064_v7 = vpack.c.bf16 %v314_v6, %v313_v5  ;;  %v1067_v10 = vpack.c.bf16 %v316_v9, %v315_v8  ;;  %v317_v11 = vld [vmem:[#allocation7 + $0x50] sm:$0xff]  ;;  %v318_v12 = vld [vmem:[#allocation7 + $0x58] sm:$0xff]  ;;  %v319_v14 = vld [vmem:[#allocation7 + $0x60] sm:$0xff] }
  0x47   :  { %1057 = vmatprep.subr.bf16.mxu1 %v1264_v0  ;;  %v1070_v13 = vpack.c.bf16 %v318_v12, %v317_v11  ;;  %v321_v20 = vld [vmem:[#allocation7 + $0x70] sm:$0xff]  ;;  %v400_v23 = vld [vmem:[#allocation7 + $0x80] sm:$0xff]  ;;  %v510_v60 = vld [vmem:[#allocation7 + $0x1b8] sm:$0xff] }
  0x48   :  { %1014 = vmatpush3.bf16.msra.mxu0 %v1013_v15  ;;  %v320_v15 = vld [vmem:[#allocation7 + $0x68] sm:$0xff]  ;;  %v402_v25 = vld [vmem:[#allocation7 + $0x90] sm:$0xff]  ;;  %v404_v29 = vld [vmem:[#allocation7 + $0xa0] sm:$0xff] }
  0x49   :  { %1015 = vmatprep.subr.bf16.mxu0 %v1264_v0  ;;  %v1073_v16 = vpack.c.bf16 %v320_v15, %v319_v14  ;;  %v406_v32 = vld [vmem:[#allocation7 + $0xb0] sm:$0xff]  ;;  %v412_v41 = vld [vmem:[#allocation7 + $0xe0] sm:$0xff] }
  0x4a   :  { %1059 = vmatpush3.bf16.msra.mxu1 %v1058_v63  ;;  %v410_v38 = vld [vmem:[#allocation7 + $0xd0] sm:$0xff]  ;;  %v503_v44 = vld [vmem:[#allocation7 + $0x180] sm:$0xff]  ;;  %v512_v63 = vld [vmem:[#allocation7 + $0x1c8] sm:$0xff] }
  0x4b   :  { %1060 = vmatprep.subr.bf16.mxu1 %v1264_v0  ;;  %v414_v50 = vld [vmem:[#allocation7 + $0xf0] sm:$0xff]  ;;  %v507_v56 = vld [vmem:[#allocation7 + $0x1a0] sm:$0xff] }
  0x4c   :  { %1017 = vmatpush3.bf16.msra.mxu0 %v1016_v18  ;;  %v505_v52 = vld [vmem:[#allocation7 + $0x190] sm:$0xff]  ;;  %v511_v62 = vld [vmem:[#allocation7 + $0x1c0] sm:$0xff] }
  0x4d   :  { %1018 = vmatprep.subr.bf16.mxu0 %v1264_v0  ;;  %v509_v59 = vld [vmem:[#allocation7 + $0x1b0] sm:$0xff]  ;;  %v1115_v2 = vpack.c.bf16 %v512_v63, %v511_v62  ;;  %v515_v6 = vld [vmem:[#allocation7 + $0x1e0] sm:$0xff] }
  0x4e   :  { %1062 = vmatpush3.bf16.msra.mxu1 %v1061_v4  ;;  %v1112_v61 = vpack.c.bf16 %v510_v60, %v509_v59  ;;  %v513_v3 = vld [vmem:[#allocation7 + $0x1d0] sm:$0xff]  ;;  %v514_v4 = vld [vmem:[#allocation7 + $0x1d8] sm:$0xff] }
  0x4f   :  { %1063 = vmatprep.subr.bf16.mxu1 %v1264_v0  ;;  %v1118_v5 = vpack.c.bf16 %v514_v4, %v513_v3  ;;  %v517_v9 = vld [vmem:[#allocation7 + $0x1f0] sm:$0xff] }
  0x50   :  { %1020 = vmatpush3.bf16.msra.mxu0 %v1019_v21  ;;  %v322_v21 = vld [vmem:[#allocation7 + $0x78] sm:$0xff] }
  0x51   :  { %1021 = vmatprep.subr.bf16.mxu0 %v1264_v0  ;;  %v1076_v22 = vpack.c.bf16 %v322_v21, %v321_v20  ;;  %v489_v21 = vld [vmem:[#allocation7 + $0x110] sm:$0xff] }
  0x52   :  { %1065 = vmatpush3.bf16.msra.mxu1 %v1064_v7  ;;  %v516_v7 = vld [vmem:[#allocation7 + $0x1e8] sm:$0xff] }
  0x53   :  { %1066 = vmatprep.subr.bf16.mxu1 %v1264_v0  ;;  %v1121_v8 = vpack.c.bf16 %v516_v7, %v515_v6 }
  0x54   :  { %1023 = vmatpush3.bf16.msra.mxu0 %v1022_v24  ;;  %v401_v24 = vld [vmem:[#allocation7 + $0x88] sm:$0xff] }
  0x55   :  { %1024 = vmatprep.subr.bf16.mxu0 %v1264_v0  ;;  %v1079_v26 = vpack.c.bf16 %v401_v24, %v400_v23 }
  0x56   :  { %1068 = vmatpush3.bf16.msra.mxu1 %v1067_v10  ;;  %v518_v10 = vld [vmem:[#allocation7 + $0x1f8] sm:$0xff] }
  0x57   :  { %1069 = vmatprep.subr.bf16.mxu1 %v1264_v0  ;;  %v1124_v11 = vpack.c.bf16 %v518_v10, %v517_v9 }
  0x58   :  { %1026 = vmatpush3.bf16.msra.mxu0 %v1025_v27  ;;  %v403_v27 = vld [vmem:[#allocation7 + $0x98] sm:$0xff] }
  0x59   :  { %1027 = vmatprep.subr.bf16.mxu0 %v1264_v0  ;;  %v1082_v28 = vpack.c.bf16 %v403_v27, %v402_v25  ;;  %v491_v25 = vld [vmem:[#allocation7 + $0x120] sm:$0xff] }
  0x5a   :  { %1071 = vmatpush3.bf16.msra.mxu1 %v1070_v13 }
  0x5b   :  { %1072 = vmatprep.subr.bf16.mxu1 %v1264_v0 }
  0x5c   :  { %1029 = vmatpush3.bf16.msra.mxu0 %v1028_v30  ;;  %v405_v30 = vld [vmem:[#allocation7 + $0xa8] sm:$0xff] }
  0x5d   :  { %1030 = vmatprep.subr.bf16.mxu0 %v1264_v0  ;;  %v1085_v31 = vpack.c.bf16 %v405_v30, %v404_v29  ;;  %v494_v29 = vld [vmem:[#allocation7 + $0x138] sm:$0xff] }
  0x5e   :  { %1074 = vmatpush3.bf16.msra.mxu1 %v1073_v16 }
  0x5f   :  { %1075 = vmatprep.subr.bf16.mxu1 %v1264_v0 }
  0x62   :  { %1077 = vmatpush3.bf16.msra.mxu1 %v1076_v22  ;;  %v490_v22 = vld [vmem:[#allocation7 + $0x118] sm:$0xff] }
  0x63   :  { %1102 = vmatprep.subr.bf16.mxu1 %v1264_v0  ;;  %v1130_v24 = vpack.c.bf16 %v490_v22, %v489_v21 }
 0x112   :  { %v128_v33 = vpop.f32.mrb[0].mxu0 }
 0x113   :  { %v132_v35 = vmax.f32 %v128_v33, 0.0  ;;  %v792_v36 = vpop.f32.mrb[1].mxu0  ;;  %v407_v33 = vld [vmem:[#allocation7 + $0xb8] sm:$0xff] }
 0x114   :  { %v409_v36 = vld [vmem:[#allocation7 + $0xc8] sm:$0xff] }
 0x115   :  { %826 = vmatmul.mubr.f32.vlgmr.msra.gmra.mrb[2].mxu0 %v132_v35  ;;  %v408_v35 = vld [vmem:[#allocation7 + $0xc0] sm:$0xff] }
 0x116   :  { %1032 = vmatpush3.bf16.msra.mxu0 %v1031_v34  ;;  %860 = vmatprep.mubr.msk.f32.mxu0 %vm1265_vm0, %v1266_v1  ;;  %v1088_v34 = vpack.c.bf16 %v407_v33, %v406_v32  ;;  %v1091_v37 = vpack.c.bf16 %v409_v36, %v408_v35  ;;  %v496_v32 = vld [vmem:[#allocation7 + $0x148] sm:$0xff]  ;;  %v499_v36 = vld [vmem:[#allocation7 + $0x160] sm:$0xff] }
 0x117   :  { %1033 = vmatprep.subr.bf16.mxu0 %v1264_v0 }
 0x11a   :  { %1035 = vmatpush3.bf16.msra.mxu0 %v1034_v39  ;;  %v411_v39 = vld [vmem:[#allocation7 + $0xd8] sm:$0xff] }
 0x11b   :  { %1036 = vmatprep.subr.bf16.mxu0 %v1264_v0  ;;  %v1094_v40 = vpack.c.bf16 %v411_v39, %v410_v38  ;;  %v501_v39 = vld [vmem:[#allocation7 + $0x170] sm:$0xff] }
 0x11e   :  { %1038 = vmatpush3.bf16.msra.mxu0 %v1037_v42  ;;  %v413_v42 = vld [vmem:[#allocation7 + $0xe8] sm:$0xff] }
 0x11f   :  { %1039 = vmatprep.subr.bf16.mxu0 %v1264_v0  ;;  %v1097_v43 = vpack.c.bf16 %v413_v42, %v412_v41 }
 0x122   :  { %1041 = vmatpush3.bf16.msra.mxu0 %v1040_v45  ;;  %v504_v45 = vld [vmem:[#allocation7 + $0x188] sm:$0xff] }
 0x123   :  { %1042 = vmatprep.subr.bf16.mxu0 %v1264_v0  ;;  %v1103_v47 = vpack.c.bf16 %v504_v45, %v503_v44 }
 0x126   :  { %1044 = vmatpush3.bf16.msra.mxu0 %v1043_v48 }
 0x127   :  { %1045 = vmatprep.subr.bf16.mxu0 %v1264_v0 }
 0x12a   :  { %1047 = vmatpush3.bf16.msra.mxu0 %v1046_v51  ;;  %v415_v51 = vld [vmem:[#allocation7 + $0xf8] sm:$0xff] }
 0x12b   :  { %1048 = vmatprep.subr.bf16.mxu0 %v1264_v0  ;;  %v1100_v53 = vpack.c.bf16 %v415_v51, %v414_v50 }
 0x12e   :  { %1050 = vmatpush3.bf16.msra.mxu0 %v1049_v54  ;;  %v506_v54 = vld [vmem:[#allocation7 + $0x198] sm:$0xff] }
 0x12f   :  { %1051 = vmatprep.subr.bf16.mxu0 %v1264_v0  ;;  %v1106_v55 = vpack.c.bf16 %v506_v54, %v505_v52 }
 0x132   :  { %1053 = vmatpush3.bf16.msra.mxu0 %v1052_v57  ;;  %v508_v57 = vld [vmem:[#allocation7 + $0x1a8] sm:$0xff] }
 0x133   :  { %1078 = vmatprep.subr.bf16.mxu0 %v1264_v0  ;;  %v1109_v58 = vpack.c.bf16 %v508_v57, %v507_v56 }
 0x1e8   :  { %v215_v17 = vpop.f32.mrb[2].mxu0 }
 0x1e9   :  { %v219_v18 = vmax.f32 %v215_v17, 0.0  ;;  %v827_v19 = vpop.f32.mrb[3].mxu0 }
 0x1ea   :  { %v488_v19 = vld [vmem:[#allocation7 + $0x108] sm:$0xff] }
 0x1eb   :  { %861 = vmatmul.mubr.f32.vlgmr.msra.gmra.mrb[4].mxu0 %v219_v18  ;;  %v487_v18 = vld [vmem:[#allocation7 + $0x100] sm:$0xff] }
 0x1ec   :  { %930 = vmatprep.mubr.msk.f32.mxu0 %vm1265_vm0, %v1266_v1  ;;  %1080 = vmatpush3.bf16.msra.mxu0 %v1079_v26  ;;  %v1127_v20 = vpack.c.bf16 %v488_v19, %v487_v18  ;;  %v492_v26 = vld [vmem:[#allocation7 + $0x128] sm:$0xff] }
 0x1ed   :  { %1081 = vmatprep.subr.bf16.mxu0 %v1264_v0  ;;  %v1133_v27 = vpack.c.bf16 %v492_v26, %v491_v25 }
 0x1f0   :  { %1083 = vmatpush3.bf16.msra.mxu0 %v1082_v28  ;;  %v493_v28 = vld [vmem:[#allocation7 + $0x130] sm:$0xff] }
 0x1f1   :  { %1084 = vmatprep.subr.bf16.mxu0 %v1264_v0  ;;  %v1136_v30 = vpack.c.bf16 %v494_v29, %v493_v28 }
 0x1f4   :  { %1086 = vmatpush3.bf16.msra.mxu0 %v1085_v31  ;;  %v495_v31 = vld [vmem:[#allocation7 + $0x140] sm:$0xff] }
 0x1f5   :  { %1087 = vmatprep.subr.bf16.mxu0 %v1264_v0  ;;  %v1139_v33 = vpack.c.bf16 %v496_v32, %v495_v31 }
 0x1f8   :  { %1089 = vmatpush3.bf16.msra.mxu0 %v1088_v34  ;;  %v498_v34 = vld [vmem:[#allocation7 + $0x158] sm:$0xff] }
 0x1f9   :  { %1090 = vmatprep.subr.bf16.mxu0 %v1264_v0 }
 0x1fc   :  { %1092 = vmatpush3.bf16.msra.mxu0 %v1091_v37  ;;  %v500_v37 = vld [vmem:[#allocation7 + $0x168] sm:$0xff] }
 0x1fd   :  { %1093 = vmatprep.subr.bf16.mxu0 %v1264_v0  ;;  %v1145_v38 = vpack.c.bf16 %v500_v37, %v499_v36 }
 0x200   :  { %1095 = vmatpush3.bf16.msra.mxu0 %v1094_v40  ;;  %v502_v40 = vld [vmem:[#allocation7 + $0x178] sm:$0xff] }
 0x201   :  { %1096 = vmatprep.subr.bf16.mxu0 %v1264_v0  ;;  %v1148_v41 = vpack.c.bf16 %v502_v40, %v501_v39 }
 0x204   :  { %1098 = vmatpush3.bf16.msra.mxu0 %v1097_v43 }
 0x205   :  { %1099 = vmatprep.subr.bf16.mxu0 %v1264_v0 }
 0x208   :  { %1101 = vmatpush3.bf16.msra.mxu0 %v1100_v53 }
 0x2be   :  { %v302_v46 = vpop.f32.mrb[4].mxu0 }
 0x2bf   :  { %v306_v48 = vmax.f32 %v302_v46, 0.0  ;;  %v862_v49 = vpop.f32.mrb[5].mxu0 }
 0x2c1   :  { %896 = vmatmul.mubr.f32.vlgmr.msra.gmra.mrb[0].mxu1 %v306_v48 }
 0x2c2   :  { %1104 = vmatpush3.bf16.msra.mxu1 %v1103_v47  ;;  %965 = vmatprep.mubr.msk.f32.mxu1 %vm1265_vm0, %v1266_v1 }
 0x2c3   :  { %1105 = vmatprep.subr.bf16.mxu1 %v1264_v0 }
 0x2c6   :  { %1107 = vmatpush3.bf16.msra.mxu1 %v1106_v55 }
 0x2c7   :  { %1108 = vmatprep.subr.bf16.mxu1 %v1264_v0 }
 0x2ca   :  { %1110 = vmatpush3.bf16.msra.mxu1 %v1109_v58 }
 0x2cb   :  { %1111 = vmatprep.subr.bf16.mxu1 %v1264_v0 }
 0x2ce   :  { %1113 = vmatpush3.bf16.msra.mxu1 %v1112_v61 }
 0x2cf   :  { %1114 = vmatprep.subr.bf16.mxu1 %v1264_v0 }
 0x2d2   :  { %1116 = vmatpush3.bf16.msra.mxu1 %v1115_v2 }
 0x2d3   :  { %1117 = vmatprep.subr.bf16.mxu1 %v1264_v0 }
 0x2d6   :  { %1119 = vmatpush3.bf16.msra.mxu1 %v1118_v5 }
 0x2d7   :  { %1120 = vmatprep.subr.bf16.mxu1 %v1264_v0 }
 0x2da   :  { %1122 = vmatpush3.bf16.msra.mxu1 %v1121_v8 }
 0x2db   :  { %1123 = vmatprep.subr.bf16.mxu1 %v1264_v0 }
 0x2de   :  { %1125 = vmatpush3.bf16.msra.mxu1 %v1124_v11 }
 0x2df   :  { %1126 = vmatprep.subr.bf16.mxu1 %v1264_v0 }
 0x394   :  { %v389_v12 = vpop.f32.mrb[0].mxu1 }
 0x395   :  { %v393_v13 = vmax.f32 %v389_v12, 0.0  ;;  %v677_v14 = vmul.f32 -1.442695, %v389_v12  ;;  %v897_v15 = vpop.f32.mrb[1].mxu1 }
 0x397   :  { %1161 = vpow2.f32 %v677_v14  ;;  %931 = vmatmul.mubr.f32.vlgmr.msra.gmra.mrb[6].mxu0 %v393_v13 }
 0x3a1   :  { %v1162_v16 = vpop.eup %1161 }
 0x3a2   :  { %v397_v17 = vadd.f32 1.0, %v1162_v16 }
 0x3a4   :  { %1163 = vrcp.f32 %v397_v17 }
 0x3ae   :  { %v1164_v23 = vpop.eup %1163 }
 0x3af   :  { %966 = vmatmul.mubr.f32.vlgmr.msra.gmra.mrb[2].mxu1 %v1164_v23 }
 0x3b0   :  { %1128 = vmatpush3.bf16.msra.mxu1 %v1127_v20  ;;  %1000 = vmatprep.mubr.msk.f32.mxu1 %vm1265_vm0, %v1266_v1  ;;  %v497_v1 = vld [vmem:[#allocation7 + $0x150] sm:$0xff] }
 0x3b1   :  { %1129 = vmatprep.subr.bf16.mxu1 %v1264_v0  ;;  %v1142_v35 = vpack.c.bf16 %v498_v34, %v497_v1 }
 0x3b4   :  { %1131 = vmatpush3.bf16.msra.mxu1 %v1130_v24 }
 0x3b5   :  { %1132 = vmatprep.subr.bf16.mxu1 %v1264_v0 }
 0x3b8   :  { %1134 = vmatpush3.bf16.msra.mxu1 %v1133_v27 }
 0x3b9   :  { %1135 = vmatprep.subr.bf16.mxu1 %v1264_v0 }
 0x3bc   :  { %1137 = vmatpush3.bf16.msra.mxu1 %v1136_v30 }
 0x3bd   :  { %1138 = vmatprep.subr.bf16.mxu1 %v1264_v0 }
 0x3c0   :  { %1140 = vmatpush3.bf16.msra.mxu1 %v1139_v33 }
 0x3c1   :  { %1141 = vmatprep.subr.bf16.mxu1 %v1264_v0 }
 0x3c4   :  { %1143 = vmatpush3.bf16.msra.mxu1 %v1142_v35 }
 0x3c5   :  { %1144 = vmatprep.subr.bf16.mxu1 %v1264_v0 }
 0x3c8   :  { %1146 = vmatpush3.bf16.msra.mxu1 %v1145_v38 }
 0x3c9   :  { %1147 = vmatprep.subr.bf16.mxu1 %v1264_v0 }
 0x3cc   :  { %1149 = vmatpush3.bf16.msra.mxu1 %v1148_v41 }
 0x46a   :  { %v482_v42 = vpop.f32.mrb[6].mxu0 }
 0x46b   :  { %v486_v43 = vmax.f32 %v482_v42, 0.0  ;;  %v932_v44 = vpop.f32.mrb[7].mxu0 }
 0x46d   :  { %1001 = vmatmul.mubr.f32.vlgmr.msra.gmra.mrb[2].mxu1 %v486_v43 }
 0x540   :  { %v655_v45 = vpop.f32.mrb[2].mxu1 }
 0x541   :  { %659 = vst [vmem:[#allocation8] sm:$0xff] %v655_v45  ;;  %v1002_v46 = vpop.f32.mrb[3].mxu1 }
 0x542   :  { %1242 = shalt.err (!%p1239_p0)
}
 0x543   :  { %s1243_s25 = scalar_lea.hbm %s1409_s3, 128 }
 0x544   :  { %p1244_p1 = scmp.ne.s32.totalorder %s1409_s3, %s1243_s25  ;;  %p1247_p2 = scmp.lt.u32.totalorder %s1243_s25, %s1409_s3 }
 0x546   :  { %p1249_p3 = pnand %p1247_p2, %p1244_p1 }
 0x548   :  { %1252 = shalt.err (!%p1249_p3)
}
 0x549   :  { %669 = dma.vmem_to_hbm [thread:$0]  %s667_s21, 128, %s1409_s3, [#allocation4]  }
 0x54a   :  { %1257 = dma.done.wait [#allocation4], 128  }
 0x54b   :  { %1258 = vsyncadd [#allocation4], 4294967168 }
 0x54c   :  { %673 = vsyncpa [#allocation3], 1 }
 0x54d   :  { %674 = vsyncpa [#allocation6], 1 }
 0x54e   :  { %675 = vsyncpa [#allocation4], 1 }

</bundles_post_ra>
